<compile_context>
chip_gen: v7x
topology: tpu7x:2x2x1
jax: 0.10.0
libtpu: 0.0.40
codegen_flags: <defaults>
</compile_context>

<pallas_src>
import functools

import jax
import jax.numpy as jnp
from jax.experimental import pallas as pl
from jax.experimental.pallas import tpu as pltpu


def _vq_l2_kernel(lat_ref, emb_ref, embt_ref, embsq_ref,
                  xq_ref, d_ref, idx_ref, oh_ref, sse_ref,
                  *, n_valid, tm, masked):
    """One grid step: a (tm, e_dim) latent tile vs. the full resident codebook."""
    i = pl.program_id(0)

    lat = lat_ref[...].astype(jnp.float32)               # (tm, e_dim)
    emb = emb_ref[...]                                    # (n_e, e_dim) resident
    emb_t = embt_ref[...]                                 # (e_dim, n_e) resident (no per-step .T)
    emb_sq = embsq_ref[...]                               # (1, n_e)  hoisted ||e||^2

    # d = ||z||^2 + ||e||^2 - 2 z.E^T   -> (tm, n_e)
    lat_sq = jnp.sum(lat * lat, axis=1, keepdims=True)                  # (tm, 1)
    cross = jnp.dot(lat, emb_t, preferred_element_type=jnp.float32)     # (tm, n_e)  MXU
    d = lat_sq + emb_sq - 2.0 * cross
    d_ref[...] = d                                                      # logit output

    # First-minimal argmin over the codebook axis (matches torch.argmin for
    # non-tied inputs), stored lane-dense as a (1, tm) row.
    idx = jnp.argmin(d, axis=-1).astype(jnp.int32)                      # (tm,)
    idx_ref[...] = idx[None, :]

    # One-hot codes, and codebook lookup as one_hot @ E (MXU-friendly gather).
    lane = jax.lax.broadcasted_iota(jnp.int32, d.shape, 1)              # (tm, n_e)
    oh = (lane == idx[:, None]).astype(jnp.float32)
    oh_ref[...] = oh
    xq = jnp.dot(oh, emb, preferred_element_type=jnp.float32)           # (tm, e_dim)
    xq_ref[...] = xq.astype(xq_ref.dtype)

    # Per-tile partial sum of squared errors; rows past n_valid (ragged final
    # block) are zeroed with a select (NaN-safe: padded lat rows are undefined).
    diff = xq - lat
    if masked:
        row = jax.lax.broadcasted_iota(jnp.int32, diff.shape, 0) + i * tm
        diff = jnp.where(row < n_valid, diff, 0.0)
    sse_ref[...] = jnp.sum(diff * diff, keepdims=True)                  # (1, 1)


@functools.partial(jax.jit, static_argnames=("beta", "tm"))
def vector_quantizer_forward(x, codebook, *, beta=0.25, tm=2048):
    """Pallas equivalent of VectorQuantizer.forward with dist='l2'.

    Returns (x_q, loss, indices, code_one_hot, logit); x_q via straight-through
    is numerically identical to the quantized values in the forward pass.
    """
    # TODO(synk): dist='dot' / 'cos' paths (with cross-entropy loss) not implemented.
    # TODO(synk): forward only — straight-through / sg() gradient split needs a custom_vjp.
    # TODO(synk): kmeans_init codebook initialization is training-time host logic, not a kernel.
    n_e, e_dim = codebook.shape
    orig_shape = x.shape
    latent = x.reshape(-1, e_dim)                  # no cast, no pad: one HBM read
    n = latent.shape[0]
    x_bytes = jnp.dtype(x.dtype).itemsize

    # ---------------- tile size / VMEM budget ----------------
    try:                                           # v5e/v6e: 128 MiB, v7x: 64 MiB
        vmem_cap = int(pltpu.get_tpu_info().vmem_capacity_bytes)
    except Exception:
        vmem_cap = 64 * 1024 * 1024                # conservative (v7x-sized) fallback
    vmem_limit = int(min(vmem_cap * 3 // 4, 100 * 1024 * 1024))

    # Per-token-row VMEM bytes: double-buffered pipeline blocks + f32 temporaries.
    io_row = 2 * x_bytes * e_dim + 2 * 4 * n_e + 4          # latent + x_q + d + one_hot + idx
    tmp_row = 4 * (3 * n_e + 3 * e_dim)                     # cross/d/oh + lat/xq/diff temps
    resident = 4 * (2 * n_e * e_dim + n_e)                  # emb, emb_t, ||e||^2
    budget = (vmem_limit * 3) // 5 - 2 * resident - (2 << 20)
    tm_fit = max(128, (budget // (2 * io_row + tmp_row)) // 128 * 128)

    tm = max(128, (int(tm) // 128) * 128)                   # lane-dense idx rows
    tm = min(tm, tm_fit)                                    # fit the scoped VMEM budget
    tm = min(tm, max(128, pl.cdiv(pl.cdiv(n, 2), 128) * 128))  # >=2 grid steps -> both v7x TCs
    tm = min(tm, pl.cdiv(n, 128) * 128)                     # don't over-tile tiny inputs
    n_tiles = pl.cdiv(n, tm)

    emb = codebook.astype(jnp.float32)
    emb_t = emb.T                                           # tiny one-time transpose (8 KB here)
    emb_sq = jnp.sum(emb * emb, axis=1)[None, :]            # (1, n_e), hoisted out of the kernel

    kernel = functools.partial(
        _vq_l2_kernel, n_valid=n, tm=tm, masked=(n % tm != 0))

    out_shapes = (
        jax.ShapeDtypeStruct((n, e_dim), x.dtype),          # x_q (flat, exact size, x.dtype)
        jax.ShapeDtypeStruct((n, n_e), jnp.float32),        # logit / distances
        jax.ShapeDtypeStruct((n_tiles, tm), jnp.int32),     # indices (lane-dense rows)
        jax.ShapeDtypeStruct((n, n_e), jnp.float32),        # one-hot codes
        jax.ShapeDtypeStruct((n_tiles, 1), jnp.float32),    # per-tile SSE partials
    )

    xq_flat, d, idx2d, one_hot, sse = pl.pallas_call(
        kernel,
        out_shape=out_shapes,
        grid_spec=pltpu.PrefetchScalarGridSpec(
            num_scalar_prefetch=0,
            grid=(n_tiles,),
            in_specs=[
                pl.BlockSpec((tm, e_dim), lambda i: (i, 0)),   # latent tile
                pl.BlockSpec((n_e, e_dim), lambda i: (0, 0)),  # codebook (resident)
                pl.BlockSpec((e_dim, n_e), lambda i: (0, 0)),  # codebook^T (resident)
                pl.BlockSpec((1, n_e), lambda i: (0, 0)),      # hoisted ||e||^2 (resident)
            ],
            out_specs=[
                pl.BlockSpec((tm, e_dim), lambda i: (i, 0)),
                pl.BlockSpec((tm, n_e), lambda i: (i, 0)),
                pl.BlockSpec((1, tm), lambda i: (i, 0)),
                pl.BlockSpec((tm, n_e), lambda i: (i, 0)),
                pl.BlockSpec((1, 1), lambda i: (i, 0)),
            ],
        ),
        compiler_params=pltpu.CompilerParams(
            # no cross-iteration state -> fully parallel grid (2 TCs on v7x)
            dimension_semantics=("parallel",),
            vmem_limit_bytes=vmem_limit,
        ),
    )(latent, emb, emb_t, emb_sq)

    mse = jnp.sum(sse) / jnp.float32(n * e_dim)
    # codebook_loss + beta * commitment_loss; both equal the same MSE in the fwd pass
    loss = mse + jnp.float32(beta) * mse

    x_q = xq_flat.reshape(orig_shape)                 # straight-through value: x + (x_q - x)
    indices = idx2d.reshape(-1)[:n].reshape(orig_shape[:-1])
    return x_q, loss, indices, one_hot, d


def _reference(x, codebook, beta):
    """Pure-JAX reference of the l2 forward path for sanity checking."""
    e_dim = codebook.shape[1]
    latent = x.reshape(-1, e_dim)
    d = (jnp.sum(latent**2, axis=1, keepdims=True)
         + jnp.sum(codebook**2, axis=1)[None, :]
         - 2.0 * latent @ codebook.T)
    idx = jnp.argmin(d, axis=-1)
    oh = jax.nn.one_hot(idx, codebook.shape[0], dtype=jnp.float32)
    xq = codebook[idx].reshape(x.shape)
    mse = jnp.mean((xq - x) ** 2)
    loss = mse + beta * mse
    return xq, loss, idx.reshape(x.shape[:-1]), oh, d


def _check(x, codebook, beta, tm):
    x_q, loss, indices, one_hot, logit = vector_quantizer_forward(
        x, codebook, beta=beta, tm=tm)
    jax.block_until_ready((x_q, loss, indices, one_hot, logit))

    rxq, rloss, ridx, roh, rd = _reference(x, codebook, beta)
    n = x.reshape(-1, codebook.shape[1]).shape[0]
    assert x_q.shape == x.shape
    assert indices.shape == x.shape[:-1]
    assert one_hot.shape == (n, codebook.shape[0])
    assert logit.shape == (n, codebook.shape[0])
    assert jnp.allclose(x_q, rxq, atol=1e-5)
    assert jnp.allclose(logit, rd, atol=1e-4)
    assert jnp.array_equal(indices, ridx)
    assert jnp.array_equal(one_hot, roh)
    assert jnp.allclose(loss, rloss, atol=1e-6)


if __name__ == "__main__":
    # config: e_dim=32, n_e=64, beta=0.25, dist='l2'
    B, H, W, E_DIM = 2, 4, 4, 32
    N_E = 64
    BETA = 0.25

    key = jax.random.PRNGKey(0)
    kx, ke, kx2 = jax.random.split(key, 3)
    x = jax.random.normal(kx, (B, H, W, E_DIM), dtype=jnp.float32)
    # embedding.weight.data.uniform_(-1/n_e, 1/n_e), deterministic
    codebook = jax.random.uniform(
        ke, (N_E, E_DIM), dtype=jnp.float32, minval=-1.0 / N_E, maxval=1.0 / N_E
    )

    # main check: n=32 tokens, single (masked) tile, auto-derived tm
    _check(x, codebook, BETA, tm=2048)

    # multi-tile check: n=150 tokens with tm=128 -> 2 tiles, ragged final block
    x2 = jax.random.normal(kx2, (2, 5, 15, E_DIM), dtype=jnp.float32)
    _check(x2, codebook, BETA, tm=128)

    print("KERNEL_OK")
</pallas_src>

<mosaic_0001>
module attributes {stable_mosaic.version = 11 : i64} {
  func.func @_vq_l2_kernel(%arg0: i32, %arg1: memref<128x32xf32, #tpu.memory_space<vmem>>, %arg2: memref<64x32xf32, #tpu.memory_space<vmem>>, %arg3: memref<32x64xf32, #tpu.memory_space<vmem>>, %arg4: memref<1x64xf32, #tpu.memory_space<vmem>>, %arg5: memref<128x32xf32, #tpu.memory_space<vmem>>, %arg6: memref<128x64xf32, #tpu.memory_space<vmem>>, %arg7: memref<1x128xi32, #tpu.memory_space<vmem>>, %arg8: memref<128x64xf32, #tpu.memory_space<vmem>>, %arg9: memref<1x1xf32, #tpu.memory_space<vmem>>) attributes {dimension_semantics = [#tpu.dimension_semantics<parallel>], iteration_bounds = array<i64: 1>, scalar_prefetch = 0 : i64, scratch_operands = 0 : i64, tpu.core_type = #tpu.core_type<tc>, window_params = [{transform_indices = @transform_0, window_bounds = array<i64: 128, 32>}, {pipeline_mode = #tpu.pipeline_mode<synchronous>, transform_indices = @transform_1, window_bounds = array<i64: 64, 32>}, {pipeline_mode = #tpu.pipeline_mode<synchronous>, transform_indices = @transform_2, window_bounds = array<i64: 32, 64>}, {pipeline_mode = #tpu.pipeline_mode<synchronous>, transform_indices = @transform_3, window_bounds = array<i64: 1, 64>}, {transform_indices = @transform_4, window_bounds = array<i64: 128, 32>}, {transform_indices = @transform_5, window_bounds = array<i64: 128, 64>}, {transform_indices = @transform_6, window_bounds = array<i64: 1, 128>}, {transform_indices = @transform_7, window_bounds = array<i64: 128, 64>}, {transform_indices = @transform_8, window_bounds = array<i64: 1, 1>}]} {
    %c0 = arith.constant 0 : index
    %c0_0 = arith.constant 0 : index
    %0 = vector.load %arg1[%c0, %c0_0] : memref<128x32xf32, #tpu.memory_space<vmem>>, vector<128x32xf32>
    %c0_1 = arith.constant 0 : index
    %c0_2 = arith.constant 0 : index
    %1 = vector.load %arg2[%c0_1, %c0_2] : memref<64x32xf32, #tpu.memory_space<vmem>>, vector<64x32xf32>
    %c0_3 = arith.constant 0 : index
    %c0_4 = arith.constant 0 : index
    %2 = vector.load %arg3[%c0_3, %c0_4] : memref<32x64xf32, #tpu.memory_space<vmem>>, vector<32x64xf32>
    %c0_5 = arith.constant 0 : index
    %c0_6 = arith.constant 0 : index
    %3 = vector.load %arg4[%c0_5, %c0_6] : memref<1x64xf32, #tpu.memory_space<vmem>>, vector<1x64xf32>
    %4 = arith.mulf %0, %0 : vector<128x32xf32>
    %cst = arith.constant dense<0.000000e+00> : vector<128xf32>
    %5 = vector.multi_reduction <add>, %4, %cst [1] : vector<128x32xf32> to vector<128xf32>
    %6 = vector.shape_cast %5 : vector<128xf32> to vector<128x1xf32>
    %cst_7 = arith.constant dense<0.000000e+00> : vector<128x64xf32>
    %7 = tpu.matmul %0, %2, %cst_7 {dimension_numbers = #tpu.dot_dimension_numbers<[1], [0], [0], [1], [0, 0, 1, 1], [], []>} : vector<128x32xf32>, vector<32x64xf32>, vector<128x64xf32> -> vector<128x64xf32>
    %8 = vector.broadcast %6 : vector<128x1xf32> to vector<128x64xf32>
    %9 = vector.broadcast %3 : vector<1x64xf32> to vector<128x64xf32>
    %10 = arith.addf %8, %9 : vector<128x64xf32>
    %cst_8 = arith.constant 2.000000e+00 : f32
    %11 = vector.broadcast %cst_8 : f32 to vector<128x64xf32>
    %12 = arith.mulf %11, %7 : vector<128x64xf32>
    %13 = arith.subf %10, %12 : vector<128x64xf32>
    %c0_9 = arith.constant 0 : index
    %c0_10 = arith.constant 0 : index
    %14 = vector.load %arg6[%c0_9, %c0_10] : memref<128x64xf32, #tpu.memory_space<vmem>>, vector<128x64xf32>
    tpu.vector_store %arg6[%c0_9, %c0_10], %13 {strides = array<i32>} : memref<128x64xf32, #tpu.memory_space<vmem>>, vector<128x64xf32>,
    %15 = tpu.reduce_index %13 {axis = 1 : i32, kind = #tpu.reduction_kind<arg_min>} : vector<128x64xf32> -> vector<128xi32>
    %16 = vector.shape_cast %15 : vector<128xi32> to vector<1x128xi32>
    %c0_11 = arith.constant 0 : index
    %c0_12 = arith.constant 0 : index
    %17 = vector.load %arg7[%c0_11, %c0_12] : memref<1x128xi32, #tpu.memory_space<vmem>>, vector<1x128xi32>
    tpu.vector_store %arg7[%c0_11, %c0_12], %16 {strides = array<i32>} : memref<1x128xi32, #tpu.memory_space<vmem>>, vector<1x128xi32>,
    %18 = tpu.iota {dimensions = array<i32: 1>} : vector<128x64xi32>
    %19 = vector.shape_cast %15 : vector<128xi32> to vector<128x1xi32>
    %20 = vector.broadcast %19 : vector<128x1xi32> to vector<128x64xi32>
    %21 = arith.cmpi eq, %18, %20 : vector<128x64xi32>
    %22 = arith.extui %21 : vector<128x64xi1> to vector<128x64xi32>
    %23 = arith.sitofp %22 : vector<128x64xi32> to vector<128x64xf32>
    %c0_13 = arith.constant 0 : index
    %c0_14 = arith.constant 0 : index
    %24 = vector.load %arg8[%c0_13, %c0_14] : memref<128x64xf32, #tpu.memory_space<vmem>>, vector<128x64xf32>
    tpu.vector_store %arg8[%c0_13, %c0_14], %23 {strides = array<i32>} : memref<128x64xf32, #tpu.memory_space<vmem>>, vector<128x64xf32>,
    %cst_15 = arith.constant dense<0.000000e+00> : vector<128x32xf32>
    %25 = tpu.matmul %23, %1, %cst_15 {dimension_numbers = #tpu.dot_dimension_numbers<[1], [0], [0], [1], [0, 0, 1, 1], [], []>} : vector<128x64xf32>, vector<64x32xf32>, vector<128x32xf32> -> vector<128x32xf32>
    %c0_16 = arith.constant 0 : index
    %c0_17 = arith.constant 0 : index
    %26 = vector.load %arg5[%c0_16, %c0_17] : memref<128x32xf32, #tpu.memory_space<vmem>>, vector<128x32xf32>
    tpu.vector_store %arg5[%c0_16, %c0_17], %25 {strides = array<i32>} : memref<128x32xf32, #tpu.memory_space<vmem>>, vector<128x32xf32>,
    %27 = arith.subf %25, %0 : vector<128x32xf32>
    %28 = tpu.iota {dimensions = array<i32: 0>} : vector<128x32xi32>
    %c128_i32 = arith.constant 128 : i32
    %29 = arith.muli %arg0, %c128_i32 : i32
    %30 = vector.broadcast %29 : i32 to vector<128x32xi32>
    %31 = arith.addi %28, %30 : vector<128x32xi32>
    %c32_i32 = arith.constant 32 : i32
    %32 = vector.broadcast %c32_i32 : i32 to vector<128x32xi32>
    %33 = arith.cmpi slt, %31, %32 : vector<128x32xi32>
    %cst_18 = arith.constant 0.000000e+00 : f32
    %34 = vector.broadcast %cst_18 : f32 to vector<128x32xf32>
    %35 = arith.select %33, %27, %34 : vector<128x32xi1>, vector<128x32xf32>
    %36 = arith.mulf %35, %35 : vector<128x32xf32>
    %37 = vector.shape_cast %36 : vector<128x32xf32> to vector<1x128x32xf32>
    %cst_19 = arith.constant dense<0.000000e+00> : vector<1xf32>
    %38 = vector.multi_reduction <add>, %37, %cst_19 [1, 2] : vector<1x128x32xf32> to vector<1xf32>
    %39 = vector.shape_cast %38 : vector<1xf32> to vector<1x1x1xf32>
    %40 = vector.extract %39[0, 0, 0] : f32 from vector<1x1x1xf32>
    %41 = vector.broadcast %40 : f32 to vector<1x1xf32>
    %c0_20 = arith.constant 0 : index
    %c0_21 = arith.constant 0 : index
    %42 = vector.load %arg9[%c0_20, %c0_21] : memref<1x1xf32, #tpu.memory_space<vmem>>, vector<1x1xf32>
    tpu.vector_store %arg9[%c0_20, %c0_21], %41 {strides = array<i32>} : memref<1x1xf32, #tpu.memory_space<vmem>>, vector<1x1xf32>,
    return
  }
  func.func @transform_0(%arg0: i32) -> (i32, i32) {
    %c0_i32 = arith.constant 0 : i32
    %c0_i32_0 = arith.constant 0 : i32
    return %arg0, %c0_i32 : i32, i32
  }
  func.func @transform_1(%arg0: i32) -> (i32, i32) {
    %c0_i32 = arith.constant 0 : i32
    %c0_i32_0 = arith.constant 0 : i32
    %c0_i32_1 = arith.constant 0 : i32
    return %c0_i32, %c0_i32_0 : i32, i32
  }
  func.func @transform_2(%arg0: i32) -> (i32, i32) {
    %c0_i32 = arith.constant 0 : i32
    %c0_i32_0 = arith.constant 0 : i32
    %c0_i32_1 = arith.constant 0 : i32
    return %c0_i32, %c0_i32_0 : i32, i32
  }
  func.func @transform_3(%arg0: i32) -> (i32, i32) {
    %c0_i32 = arith.constant 0 : i32
    %c0_i32_0 = arith.constant 0 : i32
    %c0_i32_1 = arith.constant 0 : i32
    return %c0_i32, %c0_i32_0 : i32, i32
  }
  func.func @transform_4(%arg0: i32) -> (i32, i32) {
    %c0_i32 = arith.constant 0 : i32
    %c0_i32_0 = arith.constant 0 : i32
    return %arg0, %c0_i32 : i32, i32
  }
  func.func @transform_5(%arg0: i32) -> (i32, i32) {
    %c0_i32 = arith.constant 0 : i32
    %c0_i32_0 = arith.constant 0 : i32
    return %arg0, %c0_i32 : i32, i32
  }
  func.func @transform_6(%arg0: i32) -> (i32, i32) {
    %c0_i32 = arith.constant 0 : i32
    %c0_i32_0 = arith.constant 0 : i32
    return %arg0, %c0_i32 : i32, i32
  }
  func.func @transform_7(%arg0: i32) -> (i32, i32) {
    %c0_i32 = arith.constant 0 : i32
    %c0_i32_0 = arith.constant 0 : i32
    return %arg0, %c0_i32 : i32, i32
  }
  func.func @transform_8(%arg0: i32) -> (i32, i32) {
    %c0_i32 = arith.constant 0 : i32
    %c0_i32_0 = arith.constant 0 : i32
    return %arg0, %c0_i32 : i32, i32
  }
}

</mosaic_0001>

<bundles_post_ra>
// kernel: vector_quantizer_forward.1
= control target key start
LH: loop header
LB: loop body
LE: loop exit
PB: predicated region body
PF: predicated region fallthrough
CT: control target
= control target key end

     0   :  { %14 = vsyncpa [#allocation3], 0  ;;  %s1851_s0 = inlined_call_operand.vmem [shape: f32[32,32], index: 0, kind: input, shape index: {}]   ;;  %s1852_s1 = inlined_call_operand.vmem [shape: f32[64,32], index: 1, kind: input, shape index: {}]   ;;  %s1853_s2 = inlined_call_operand.vmem [shape: f32[32,64], index: 2, kind: input, shape index: {}]   ;;  %s1854_s3 = inlined_call_operand.vmem [shape: f32[1,64], index: 3, kind: input, shape index: {}]   ;;  %s1855_s4 = inlined_call_operand.hbm [shape: f32[32,32], index: 4, kind: output, shape index: {0}]   ;;  %s1856_s5 = inlined_call_operand.hbm [shape: f32[32,64], index: 5, kind: output, shape index: {1}]   ;;  %s1857_s6 = inlined_call_operand.vmem [shape: s32[1,128], index: 6, kind: output, shape index: {2}]   ;;  %s1858_s7 = inlined_call_operand.hbm [shape: f32[32,64], index: 7, kind: output, shape index: {3}]   ;;  %s1859_s8 = inlined_call_operand.hbm [shape: f32[1,1], index: 8, kind: output, shape index: {4}]  }
   0x1   :  { %15 = vsyncpa [#allocation5], 0 }
   0x2   :  { %16 = vsyncpa [#allocation8], 0  ;;  %v49_v0 = vld [vmem:[%s1853_s2] sm:$0xff]  ;;  %v50_v1 = vld [vmem:[%s1853_s2 + $0x8] sm:$0xff]  ;;  %vm70_vm0 = vcmask 261120   ;;  %vm366_vm1 = vcmask 523264  }
   0x3   :  { %v1188_v2 = vpack.c.bf16 %v50_v1, %v49_v0  ;;  %v51_v3 = vld [vmem:[%s1853_s2 + $0x10] sm:$0xff]  ;;  %v52_v4 = vld [vmem:[%s1853_s2 + $0x18] sm:$0xff]  ;;  %v1390_v5 = vld [vmem:[%s1851_s0] sm:$0xff]  ;;  %vm442_vm3 = vcmask 130112   ;;  %vm449_vm6 = vcmask 195712   ;;  %vm456_vm8 = vcmask 261312  }
   0x4   :  { %v1192_v6 = vpack.c.bf16 %v52_v4, %v51_v3  ;;  %1124 = vmatprep.mubr.msk.f32.mxu0 %vm70_vm0, %v1390_v5  ;;  %v1397_v7 = vld [vmem:[%s1851_s0 + $0x8] sm:$0xff]  ;;  %v1402_v8 = vld [vmem:[%s1851_s0 + $0x10] sm:$0xff]  ;;  %v1407_v9 = vld [vmem:[%s1851_s0 + $0x18] sm:$0xff]  ;;  %v54_v10 = vmul.f32 %v1390_v5, %v1390_v5  ;;  %vm463_vm9 = vcmask 326912   ;;  %vm470_vm10 = vcmask 392512  }
   0x5   :  { %1189 = vmatprep.subr.bf16.mxu0 %v1188_v2  ;;  %v56_v11 = vmul.f32 %v1402_v8, %v1402_v8  ;;  %v55_v12 = vmul.f32 %v1397_v7, %v1397_v7  ;;  %v57_v13 = vmul.f32 %v1407_v9, %v1407_v9  ;;  %v1428_v18 = vld [vmem:[%s1851_s0 + $0x20] sm:$0xff]  ;;  %v1437_v19 = vld [vmem:[%s1851_s0 + $0x28] sm:$0xff]  ;;  %v1442_v20 = vld [vmem:[%s1851_s0 + $0x30] sm:$0xff]  ;;  %vm477_vm13 = vcmask 458112  }
   0x6   :  { %1191 = vmatpush3.bf16.msra.mxu0 %v1188_v2  ;;  %v71_v14 = vsel %vm70_vm0, %v54_v10, 0.0  ;;  %v1451_v21 = vld [vmem:[%s1851_s0 + $0x38] sm:$0xff]  ;;  %v1456_v22 = vld [vmem:[%s1851_s0 + $0x40] sm:$0xff]  ;;  %v1465_v23 = vld [vmem:[%s1851_s0 + $0x48] sm:$0xff]  ;;  %v59_v0 = vmul.f32 %v1437_v19, %v1437_v19  ;;  %v58_v2 = vmul.f32 %v1428_v18, %v1428_v18  ;;  %vm484_vm14 = vcmask 523712  }
   0x7   :  { %1193 = vmatprep.subr.bf16.mxu0 %v1192_v6  ;;  %72 = vadd.xlane.f32.xlu0 %v71_v14  ;;  %v77_v15 = vsel %vm70_vm0, %v56_v11, 0.0  ;;  %v74_v16 = vsel %vm70_vm0, %v55_v12, 0.0  ;;  %v80_v17 = vsel %vm70_vm0, %v57_v13, 0.0  ;;  %v1470_v24 = vld [vmem:[%s1851_s0 + $0x50] sm:$0xff]  ;;  %v1479_v25 = vld [vmem:[%s1851_s0 + $0x58] sm:$0xff]  ;;  %v1484_v26 = vld [vmem:[%s1851_s0 + $0x60] sm:$0xff]  ;;  %v61_v10 = vmul.f32 %v1451_v21, %v1451_v21 }
   0x8   :  { %78 = vadd.xlane.f32.xlu1 %v77_v15  ;;  %v1493_v27 = vld [vmem:[%s1851_s0 + $0x68] sm:$0xff]  ;;  %v1498_v28 = vld [vmem:[%s1851_s0 + $0x70] sm:$0xff]  ;;  %v1507_v29 = vld [vmem:[%s1851_s0 + $0x78] sm:$0xff]  ;;  %v83_v11 = vsel %vm70_vm0, %v58_v2, 0.0  ;;  %v60_v12 = vmul.f32 %v1442_v20, %v1442_v20  ;;  %v63_v14 = vmul.f32 %v1465_v23, %v1465_v23 }
   0x9   :  { %v41_v30 = vld [vmem:[%s1852_s1] sm:$0xff]  ;;  %v42_v31 = vld [vmem:[%s1852_s1 + $0x8] sm:$0xff]  ;;  %v43_v32 = vld [vmem:[%s1852_s1 + $0x10] sm:$0xff]  ;;  %v92_v13 = vsel %vm70_vm0, %v61_v10, 0.0 }
   0xa   :  { %1195 = vmatpush3.bf16.msra.mxu0 %v1192_v6  ;;  %v1196_v33 = vpack.c.bf16 %v42_v31, %v41_v30  ;;  %v44_v34 = vld [vmem:[%s1852_s1 + $0x18] sm:$0xff]  ;;  %v45_v36 = vld [vmem:[%s1852_s1 + $0x20] sm:$0xff]  ;;  %v46_v37 = vld [vmem:[%s1852_s1 + $0x28] sm:$0xff]  ;;  %v86_v6 = vsel %vm70_vm0, %v59_v0, 0.0  ;;  %v89_v15 = vsel %vm70_vm0, %v60_v12, 0.0  ;;  %v66_v30 = vmul.f32 %v1484_v26, %v1484_v26 }
   0xb   :  { %75 = vadd.xlane.f32.xlu0 %v74_v16  ;;  %v1200_v35 = vpack.c.bf16 %v44_v34, %v43_v32  ;;  %v1204_v38 = vpack.c.bf16 %v46_v37, %v45_v36  ;;  %v47_v39 = vld [vmem:[%s1852_s1 + $0x30] sm:$0xff]  ;;  %v48_v40 = vld [vmem:[%s1852_s1 + $0x38] sm:$0xff]  ;;  %v1538_v45 = vld [vmem:[%s1854_s3] ss:$0 sm:$0xff]  ;;  %v62_v16 = vmul.f32 %v1456_v22, %v1456_v22  ;;  %v69_v31 = vmul.f32 %v1507_v29, %v1507_v29 }
   0xc   :  { %81 = vadd.xlane.f32.xlu1 %v80_v17  ;;  %1197 = vmatprep.subr.bf16.mxu0 %v1196_v33  ;;  %v1208_v41 = vpack.c.bf16 %v48_v40, %v47_v39  ;;  %v98_v17 = vsel %vm70_vm0, %v63_v14, 0.0  ;;  %v107_v32 = vsel %vm70_vm0, %v66_v30, 0.0 }
   0xd   :  { %1125 = vmatmul.mubr.msk.f32.vlgmr.msra.gmra.mrb[0].mxu0 %vm70_vm0, %v1397_v7  ;;  %1212 = vmatprep.subr.bf16.mxu1 %v1196_v33 }
   0xe   :  { %1127 = vmatprep.mubr.msk.f32.mxu0 %vm70_vm0, %v1402_v8  ;;  %1199 = vmatpush3.bf16.msra.mxu0 %v1196_v33 }
   0xf   :  { %1216 = vmatpush3.bf16.msra.mxu1 %v1196_v33  ;;  %1201 = vmatprep.subr.bf16.mxu0 %v1200_v35  ;;  %v68_v33 = vmul.f32 %v1498_v28, %v1498_v28 }
  0x10   :  { %1213 = vmatprep.subr.bf16.mxu1 %v1200_v35 }
  0x11   :  { %1128 = vmatmul.mubr.msk.f32.gmra.mrb[2].mxu0 %vm70_vm0, %v1407_v9  ;;  %v113_v36 = vsel %vm70_vm0, %v68_v33, 0.0 }
  0x12   :  { %1130 = vmatprep.mubr.msk.f32.mxu0 %vm70_vm0, %v1428_v18  ;;  %1203 = vmatpush3.bf16.msra.mxu0 %v1200_v35  ;;  %v65_v18 = vmul.f32 %v1479_v25, %v1479_v25 }
  0x13   :  { %1217 = vmatpush3.bf16.msra.mxu1 %v1200_v35  ;;  %1205 = vmatprep.subr.bf16.mxu0 %v1204_v38 }
  0x14   :  { %1214 = vmatprep.subr.bf16.mxu1 %v1204_v38 }
  0x15   :  { %1131 = vmatmul.mubr.msk.f32.gmra.mrb[4].mxu0 %vm70_vm0, %v1437_v19  ;;  %v95_v19 = vsel %vm70_vm0, %v62_v16, 0.0 }
  0x16   :  { %1133 = vmatprep.mubr.msk.f32.mxu0 %vm70_vm0, %v1442_v20  ;;  %1207 = vmatpush3.bf16.msra.mxu0 %v1204_v38  ;;  %v64_v20 = vmul.f32 %v1470_v24, %v1470_v24 }
  0x17   :  { %1218 = vmatpush3.bf16.msra.mxu1 %v1204_v38  ;;  %1209 = vmatprep.subr.bf16.mxu0 %v1208_v41 }
  0x18   :  { %1215 = vmatprep.subr.bf16.mxu1 %v1208_v41 }
  0x19   :  { %1134 = vmatmul.mubr.msk.f32.gmra.mrb[6].mxu0 %vm70_vm0, %v1451_v21  ;;  %v104_v21 = vsel %vm70_vm0, %v65_v18, 0.0 }
  0x1a   :  { %1136 = vmatprep.mubr.msk.f32.mxu0 %vm70_vm0, %v1456_v22  ;;  %1211 = vmatpush3.bf16.msra.mxu0 %v1208_v41  ;;  %v101_v22 = vsel %vm70_vm0, %v64_v20, 0.0 }
  0x1b   :  { %1219 = vmatpush3.bf16.msra.mxu1 %v1208_v41 }
  0x1d   :  { %1137 = vmatmul.mubr.msk.f32.gmra.mrb[8].mxu0 %vm70_vm0, %v1465_v23  ;;  %v67_v23 = vmul.f32 %v1493_v27, %v1493_v27 }
  0x1e   :  { %1139 = vmatprep.mubr.msk.f32.mxu0 %vm70_vm0, %v1470_v24 }
  0x21   :  { %1140 = vmatmul.mubr.msk.f32.gmra.mrb[10].mxu0 %vm70_vm0, %v1479_v25  ;;  %v110_v25 = vsel %vm70_vm0, %v67_v23, 0.0 }
  0x22   :  { %1142 = vmatprep.mubr.msk.f32.mxu0 %vm70_vm0, %v1484_v26  ;;  %v116_v26 = vsel %vm70_vm0, %v69_v31, 0.0 }
  0x25   :  { %1143 = vmatmul.mubr.msk.f32.gmra.mrb[12].mxu0 %vm70_vm0, %v1493_v27 }
  0x26   :  { %1145 = vmatprep.mubr.msk.f32.mxu0 %vm70_vm0, %v1498_v28 }
  0x29   :  { %1146 = vmatmul.mubr.msk.f32.gmra.mrb[14].mxu0 %vm70_vm0, %v1507_v29 }
  0x94   :  { %v73_v42 = vpop.xlane.xlu0 %72 }
  0x95   :  { %v79_v43 = vpop.xlane.xlu1 %78  ;;  %v318_v51 = vadd.f32 %v1538_v45, %v73_v42 }
  0x96   :  { %v320_v60 = vadd.f32 %v1538_v45, %v79_v43  ;;  %v431_v43 = vlaneseq }
  0x98   :  { %v76_v44 = vpop.xlane.xlu0 %75 }
  0x99   :  { %v319_v46 = vadd.f32 %v1538_v45, %v76_v44  ;;  %v82_v48 = vpop.xlane.xlu1 %81  ;;  %v1608_v44 = vand.u32 127, %v431_v43 }
  0x9a   :  { %v321_v53 = vadd.f32 %v1538_v45, %v82_v48 }
  0xe0   :  { %v1126_v47 = vpop.f32.mrb[0].mxu0 }
  0xe1   :  { %v335_v49 = vmul.f32 2.0, %v1126_v47  ;;  %v233_v50 = vpop.f32.mrb[1].mxu0  ;;  %v437_v47 = vadd.s32 4294967288, %v1608_v44 }
  0xe2   :  { %v334_v52 = vmul.f32 2.0, %v233_v50 }
  0xe3   :  { %v351_v54 = vsub.f32 %v319_v46, %v335_v49  ;;  %v1610_v46 = vshrl.u32 %v431_v43, 7  ;;  %v451_v49 = vadd.s32 4294967272, %v1608_v44 }
  0xe4   :  { %v1129_v55 = vpop.f32.mrb[2].mxu0  ;;  %v350_v56 = vsub.f32 %v318_v51, %v334_v52  ;;  %v444_v51 = vadd.s32 4294967280, %v1608_v44 }
  0xe5   :  { %v337_v57 = vmul.f32 2.0, %v1129_v55  ;;  %v243_v58 = vpop.f32.mrb[3].mxu0  ;;  %v386_v59 = vsel %vm366_vm1, %v351_v54, inf  ;;  %368 = vst.msk [vmem:[#allocation4 + $0x8] sm:$0xff] %vm366_vm1, %v351_v54  ;;  %v440_v48 = vsub.s32 %v437_v47, %v1610_v46  ;;  %v435_v50 = vsub.s32 %v1608_v44, %v1610_v46 }
  0xe6   :  { %v336_v61 = vmul.f32 2.0, %v243_v58  ;;  %387 = vmin.index.xlane.f32.xlu1 %v386_v59  ;;  %v383_v62 = vsel %vm366_vm1, %v350_v56, inf  ;;  %367 = vst.msk [vmem:[#allocation4] sm:$0xff] %vm366_vm1, %v350_v56  ;;  %v454_v55 = vsub.s32 %v451_v49, %v1610_v46  ;;  %v1323_v56 = vmov 0.0  }
  0xe7   :  { %384 = vmin.index.xlane.f32.xlu0 %v383_v62  ;;  %v353_v63 = vsub.f32 %v321_v53, %v337_v57  ;;  %v447_v59 = vsub.s32 %v444_v51, %v1610_v46 }
  0xe8   :  { %v352_v1 = vsub.f32 %v320_v60, %v336_v61  ;;  %v1132_v24 = vpop.f32.mrb[4].mxu0 }
  0xe9   :  { %370 = vst.msk [vmem:[#allocation4 + $0x18] sm:$0xff] %vm366_vm1, %v353_v63  ;;  %v392_v3 = vsel %vm366_vm1, %v353_v63, inf  ;;  %v253_v34 = vpop.f32.mrb[5].mxu0 }
  0xea   :  { %393 = vmin.index.xlane.f32.xlu1 %v392_v3  ;;  %369 = vst.msk [vmem:[#allocation4 + $0x10] sm:$0xff] %vm366_vm1, %v352_v1  ;;  %v389_v4 = vsel %vm366_vm1, %v352_v1, inf  ;;  %v339_v3 = vmul.f32 2.0, %v1132_v24  ;;  %v338_v10 = vmul.f32 2.0, %v253_v34 }
  0xeb   :  { %390 = vmin.index.xlane.f32.xlu0 %v389_v4 }
  0xec   :  { %v1586_v27 = vpop.f32.mrb[6].mxu0 }
  0xed   :  { %v1588_v35 = vpop.f32.mrb[7].mxu0  ;;  %v341_v16 = vmul.f32 2.0, %v1586_v27 }
  0xee   :  { %87 = vadd.xlane.f32.xlu1 %v86_v6  ;;  %v340_v18 = vmul.f32 2.0, %v1588_v35 }
  0xef   :  { %84 = vadd.xlane.f32.xlu0 %v83_v11 }
  0xf0   :  { %v1592_v37 = vpop.f32.mrb[8].mxu0 }
  0xf1   :  { %v1594_v29 = vpop.f32.mrb[9].mxu0  ;;  %v343_v31 = vmul.f32 2.0, %v1592_v37 }
  0xf2   :  { %93 = vadd.xlane.f32.xlu1 %v92_v13 }
  0xf3   :  { %90 = vadd.xlane.f32.xlu0 %v89_v15 }
  0xf4   :  { %v1596_v38 = vpop.f32.mrb[10].mxu0 }
  0xf5   :  { %v1598_v28 = vpop.f32.mrb[11].mxu0  ;;  %v345_v37 = vmul.f32 2.0, %v1596_v38 }
  0xf6   :  { %99 = vadd.xlane.f32.xlu1 %v98_v17  ;;  %v344_v47 = vmul.f32 2.0, %v1598_v28 }
  0xf7   :  { %96 = vadd.xlane.f32.xlu0 %v95_v19 }
  0xf8   :  { %v1600_v39 = vpop.f32.mrb[12].mxu0 }
  0xf9   :  { %v1602_v40 = vpop.f32.mrb[13].mxu0  ;;  %v347_v38 = vmul.f32 2.0, %v1600_v39 }
  0xfa   :  { %105 = vadd.xlane.f32.xlu1 %v104_v21 }
  0xfb   :  { %102 = vadd.xlane.f32.xlu0 %v101_v22 }
  0xfc   :  { %v1604_v41 = vpop.f32.mrb[14].mxu0 }
  0xfd   :  { %v1606_v42 = vpop.f32.mrb[15].mxu0  ;;  %v349_v39 = vmul.f32 2.0, %v1604_v41 }
  0xfe   :  { %111 = vadd.xlane.f32.xlu1 %v110_v25 }
  0xff   :  { %108 = vadd.xlane.f32.xlu0 %v107_v32  ;;  %v342_v32 = vmul.f32 2.0, %v1594_v29 }
 0x102   :  { %117 = vadd.xlane.f32.xlu1 %v116_v26 }
 0x103   :  { %114 = vadd.xlane.f32.xlu0 %v113_v36 }
 0x173   :  { %v388_v52 = vpop.xlane.xlu1 %387 }
 0x174   :  { %v441_v53 = vrot.slane %v388_v52, %v440_v48  ;;  %vm544_vm2 = vcmp.eq.s32.totalorder %v1608_v44, %v388_v52  ;;  %v385_v54 = vpop.xlane.xlu0 %384 }
 0x175   :  { %v1041_v57 = vsel %vm544_vm2, 1.0, %v1323_v56  ;;  %v436_v58 = vrot.slane %v385_v54, %v435_v50  ;;  %vm543_vm4 = vcmp.eq.s32.totalorder %v1608_v44, %v385_v54 }
 0x176   :  { %592 = vst.msk [vmem:[#allocation6 + $0x8] sm:$0xff] %vm366_vm1, %v1041_v57  ;;  %v1040_v60 = vsel %vm543_vm4, 1.0, %v1323_v56  ;;  %vm498_vm4 = vcmask 654912  }
 0x177   :  { %v443_v61 = vsel %vm442_vm3, %v441_v53, %v436_v58  ;;  %591 = vst.msk [vmem:[#allocation6] sm:$0xff] %vm366_vm1, %v1040_v60  ;;  %v394_v62 = vpop.xlane.xlu1 %393  ;;  %1164 = vmatprep.mubr.msk.f32.mxu0 %vm366_vm1, %v1040_v60  ;;  %vm491_vm3 = vcmask 589312  }
 0x178   :  { %v455_v63 = vrot.slane %v394_v62, %v454_v55  ;;  %vm546_vm5 = vcmp.eq.s32.totalorder %v1608_v44, %v394_v62  ;;  %1165 = vmatmul.mubr.msk.f32.vlgmr.msra.gmra.mrb[16].mxu0 %vm366_vm1, %v1041_v57  ;;  %v391_v0 = vpop.xlane.xlu0 %390  ;;  %v346_v55 = vmul.f32 2.0, %v1602_v40 }
 0x179   :  { %v1043_v1 = vsel %vm546_vm5, 1.0, %v1323_v56  ;;  %v448_v2 = vrot.slane %v391_v0, %v447_v59  ;;  %vm545_vm7 = vcmp.eq.s32.totalorder %v1608_v44, %v391_v0  ;;  %v348_v0 = vmul.f32 2.0, %v1606_v42 }
 0x17a   :  { %594 = vst.msk [vmem:[#allocation6 + $0x18] sm:$0xff] %vm366_vm1, %v1043_v1  ;;  %v1042_v4 = vsel %vm545_vm7, 1.0, %v1323_v56  ;;  %vm505_vm7 = vcmask 720512  }
 0x17b   :  { %v450_v6 = vsel %vm449_vm6, %v448_v2, %v443_v61  ;;  %593 = vst.msk [vmem:[#allocation6 + $0x10] sm:$0xff] %vm366_vm1, %v1042_v4  ;;  %1167 = vmatprep.mubr.msk.f32.mxu1 %vm366_vm1, %v1042_v4  ;;  %v88_v11 = vpop.xlane.xlu1 %87 }
 0x17c   :  { %1168 = vmatmul.mubr.msk.f32.vlgmr.msra.gmra.mrb[0].mxu1 %vm366_vm1, %v1043_v1  ;;  %v85_v12 = vpop.xlane.xlu0 %84  ;;  %v323_v13 = vadd.f32 %v1538_v45, %v88_v11  ;;  %v1637_v14 = vsel %vm456_vm8, %v455_v63, %v450_v6  ;;  %vm512_vm8 = vcmask 786112  }
 0x17d   :  { %v322_v15 = vadd.f32 %v1538_v45, %v85_v12 }
 0x17e   :  { %v355_v17 = vsub.f32 %v323_v13, %v339_v3 }
 0x17f   :  { %v94_v19 = vpop.xlane.xlu1 %93  ;;  %v354_v20 = vsub.f32 %v322_v15, %v338_v10  ;;  %v458_v15 = vadd.s32 4294967264, %v1608_v44 }
 0x180   :  { %v91_v21 = vpop.xlane.xlu0 %90  ;;  %v325_v23 = vadd.f32 %v1538_v45, %v94_v19  ;;  %v398_v22 = vsel %vm366_vm1, %v355_v17, inf  ;;  %372 = vst.msk [vmem:[#allocation4 + $0x28] sm:$0xff] %vm366_vm1, %v355_v17  ;;  %v479_v17 = vadd.s32 4294967240, %v1608_v44  ;;  %v472_v19 = vadd.s32 4294967248, %v1608_v44 }
 0x181   :  { %v324_v30 = vadd.f32 %v1538_v45, %v91_v21  ;;  %v395_v25 = vsel %vm366_vm1, %v354_v20, inf  ;;  %371 = vst.msk [vmem:[#allocation4 + $0x20] sm:$0xff] %vm366_vm1, %v354_v20  ;;  %399 = vmin.index.xlane.f32.xlu1 %v398_v22  ;;  %v486_v21 = vadd.s32 4294967232, %v1608_v44 }
 0x182   :  { %396 = vmin.index.xlane.f32.xlu0 %v395_v25  ;;  %v357_v24 = vsub.f32 %v325_v23, %v341_v16  ;;  %v493_v23 = vadd.s32 4294967224, %v1608_v44  ;;  %v482_v25 = vsub.s32 %v479_v17, %v1610_v46 }
 0x183   :  { %v100_v33 = vpop.xlane.xlu1 %99  ;;  %v356_v34 = vsub.f32 %v324_v30, %v340_v18  ;;  %v461_v18 = vsub.s32 %v458_v15, %v1610_v46 }
 0x184   :  { %v97_v27 = vpop.xlane.xlu0 %96  ;;  %v327_v35 = vadd.f32 %v1538_v45, %v100_v33  ;;  %v404_v26 = vsel %vm366_vm1, %v357_v24, inf  ;;  %374 = vst.msk [vmem:[#allocation4 + $0x38] sm:$0xff] %vm366_vm1, %v357_v24 }
 0x185   :  { %v326_v36 = vadd.f32 %v1538_v45, %v97_v27  ;;  %v401_v43 = vsel %vm366_vm1, %v356_v34, inf  ;;  %373 = vst.msk [vmem:[#allocation4 + $0x30] sm:$0xff] %vm366_vm1, %v356_v34  ;;  %405 = vmin.index.xlane.f32.xlu1 %v404_v26  ;;  %v496_v26 = vsub.s32 %v493_v23, %v1610_v46 }
 0x186   :  { %402 = vmin.index.xlane.f32.xlu0 %v401_v43  ;;  %v359_v29 = vsub.f32 %v327_v35, %v343_v31  ;;  %v489_v35 = vsub.s32 %v486_v21, %v1610_v46 }
 0x187   :  { %v106_v48 = vpop.xlane.xlu1 %105  ;;  %v358_v49 = vsub.f32 %v326_v36, %v342_v32  ;;  %v475_v32 = vsub.s32 %v472_v19, %v1610_v46 }
 0x188   :  { %v103_v50 = vpop.xlane.xlu0 %102  ;;  %v329_v51 = vadd.f32 %v1538_v45, %v106_v48  ;;  %v410_v52 = vsel %vm366_vm1, %v359_v29, inf  ;;  %376 = vst.msk [vmem:[#allocation4 + $0x48] sm:$0xff] %vm366_vm1, %v359_v29  ;;  %v507_v29 = vadd.s32 4294967208, %v1608_v44  ;;  %v500_v48 = vadd.s32 4294967216, %v1608_v44 }
 0x189   :  { %v328_v53 = vadd.f32 %v1538_v45, %v103_v50  ;;  %v407_v54 = vsel %vm366_vm1, %v358_v49, inf  ;;  %375 = vst.msk [vmem:[#allocation4 + $0x40] sm:$0xff] %vm366_vm1, %v358_v49  ;;  %411 = vmin.index.xlane.f32.xlu1 %v410_v52  ;;  %v514_v52 = vadd.s32 4294967200, %v1608_v44 }
 0x18a   :  { %408 = vmin.index.xlane.f32.xlu0 %v407_v54  ;;  %v361_v28 = vsub.f32 %v329_v51, %v345_v37 }
 0x18b   :  { %v112_v57 = vpop.xlane.xlu1 %111  ;;  %v360_v58 = vsub.f32 %v328_v53, %v344_v47  ;;  %v521_v53 = vadd.s32 4294967192, %v1608_v44 }
 0x18c   :  { %v109_v59 = vpop.xlane.xlu0 %108  ;;  %v331_v60 = vadd.f32 %v1538_v45, %v112_v57  ;;  %v416_v61 = vsel %vm366_vm1, %v361_v28, inf  ;;  %378 = vst.msk [vmem:[#allocation4 + $0x58] sm:$0xff] %vm366_vm1, %v361_v28 }
 0x18d   :  { %v330_v62 = vadd.f32 %v1538_v45, %v109_v59  ;;  %v413_v63 = vsel %vm366_vm1, %v360_v58, inf  ;;  %377 = vst.msk [vmem:[#allocation4 + $0x50] sm:$0xff] %vm366_vm1, %v360_v58  ;;  %417 = vmin.index.xlane.f32.xlu1 %v416_v61  ;;  %v503_v59 = vsub.s32 %v500_v48, %v1610_v46 }
 0x18e   :  { %414 = vmin.index.xlane.f32.xlu0 %v413_v63  ;;  %v363_v40 = vsub.f32 %v331_v60, %v347_v38  ;;  %v517_v63 = vsub.s32 %v514_v52, %v1610_v46 }
 0x18f   :  { %v118_v1 = vpop.xlane.xlu1 %117  ;;  %v362_v2 = vsub.f32 %v330_v62, %v346_v55  ;;  %v510_v55 = vsub.s32 %v507_v29, %v1610_v46 }
 0x190   :  { %v115_v3 = vpop.xlane.xlu0 %114  ;;  %v333_v4 = vadd.f32 %v1538_v45, %v118_v1  ;;  %v422_v6 = vsel %vm366_vm1, %v363_v40, inf  ;;  %380 = vst.msk [vmem:[#allocation4 + $0x68] sm:$0xff] %vm366_vm1, %v363_v40 }
 0x191   :  { %v332_v10 = vadd.f32 %v1538_v45, %v115_v3  ;;  %v419_v11 = vsel %vm366_vm1, %v362_v2, inf  ;;  %379 = vst.msk [vmem:[#allocation4 + $0x60] sm:$0xff] %vm366_vm1, %v362_v2  ;;  %423 = vmin.index.xlane.f32.xlu1 %v422_v6  ;;  %v465_v45 = vadd.s32 4294967256, %v1608_v44  ;;  %v535_v2 = vadd.s32 4294967176, %v1608_v44 }
 0x192   :  { %420 = vmin.index.xlane.f32.xlu0 %v419_v11  ;;  %v365_v41 = vsub.f32 %v333_v4, %v349_v39  ;;  %v524_v39 = vsub.s32 %v521_v53, %v1610_v46  ;;  %v528_v6 = vadd.s32 4294967184, %v1608_v44 }
 0x193   :  { %v364_v12 = vsub.f32 %v332_v10, %v348_v0  ;;  %v468_v16 = vsub.s32 %v465_v45, %v1610_v46  ;;  %v538_v45 = vsub.s32 %v535_v2, %v1610_v46 }
 0x194   :  { %v428_v42 = vsel %vm366_vm1, %v365_v41, inf  ;;  %382 = vst.msk [vmem:[#allocation4 + $0x78] sm:$0xff] %vm366_vm1, %v365_v41  ;;  %v531_v17 = vsub.s32 %v528_v6, %v1610_v46 }
 0x195   :  { %v425_v13 = vsel %vm366_vm1, %v364_v12, inf  ;;  %381 = vst.msk [vmem:[#allocation4 + $0x70] sm:$0xff] %vm366_vm1, %v364_v12  ;;  %429 = vmin.index.xlane.f32.xlu1 %v428_v42 }
 0x196   :  { %426 = vmin.index.xlane.f32.xlu0 %v425_v13 }
 0x20e   :  { %v400_v20 = vpop.xlane.xlu1 %399 }
 0x20f   :  { %v397_v22 = vpop.xlane.xlu0 %396  ;;  %v469_v30 = vrot.slane %v400_v20, %v468_v16  ;;  %vm548_vm11 = vcmp.eq.s32.totalorder %v1608_v44, %v400_v20 }
 0x210   :  { %v462_v31 = vrot.slane %v397_v22, %v461_v18  ;;  %vm547_vm12 = vcmp.eq.s32.totalorder %v1608_v44, %v397_v22  ;;  %v1045_v24 = vsel %vm548_vm11, 1.0, %v1323_v56  ;;  %vm519_vm11 = vcmask 851712  }
 0x211   :  { %v1044_v33 = vsel %vm547_vm12, 1.0, %v1323_v56  ;;  %596 = vst.msk [vmem:[#allocation6 + $0x28] sm:$0xff] %vm366_vm1, %v1045_v24  ;;  %vm526_vm12 = vcmask 917312  }
 0x212   :  { %v464_v34 = vsel %vm463_vm9, %v462_v31, %v1637_v14  ;;  %595 = vst.msk [vmem:[#allocation6 + $0x20] sm:$0xff] %vm366_vm1, %v1044_v33  ;;  %v406_v27 = vpop.xlane.xlu1 %405  ;;  %1170 = vmatprep.mubr.msk.f32.mxu1 %vm366_vm1, %v1044_v33 }
 0x213   :  { %v471_v36 = vsel %vm470_vm10, %v469_v30, %v464_v34  ;;  %v403_v43 = vpop.xlane.xlu0 %402  ;;  %v483_v37 = vrot.slane %v406_v27, %v482_v25  ;;  %vm550_vm15 = vcmp.eq.s32.totalorder %v1608_v44, %v406_v27  ;;  %1171 = vmatmul.mubr.msk.f32.gmra.mrb[2].mxu1 %vm366_vm1, %v1045_v24 }
 0x214   :  { %v476_v14 = vrot.slane %v403_v43, %v475_v32  ;;  %vm549_vm2 = vcmp.eq.s32.totalorder %v1608_v44, %v403_v43  ;;  %v1047_v47 = vsel %vm550_vm15, 1.0, %v1323_v56  ;;  %vm533_vm15 = vcmask 982912  }
 0x215   :  { %v1046_v49 = vsel %vm549_vm2, 1.0, %v1323_v56  ;;  %598 = vst.msk [vmem:[#allocation6 + $0x38] sm:$0xff] %vm366_vm1, %v1047_v47 }
 0x216   :  { %v478_v50 = vsel %vm477_vm13, %v476_v14, %v471_v36  ;;  %597 = vst.msk [vmem:[#allocation6 + $0x30] sm:$0xff] %vm366_vm1, %v1046_v49  ;;  %v412_v51 = vpop.xlane.xlu1 %411  ;;  %1173 = vmatprep.mubr.msk.f32.mxu1 %vm366_vm1, %v1046_v49 }
 0x217   :  { %v485_v54 = vsel %vm484_vm14, %v483_v37, %v478_v50  ;;  %v409_v38 = vpop.xlane.xlu0 %408  ;;  %v497_v28 = vrot.slane %v412_v51, %v496_v26  ;;  %vm552_vm5 = vcmp.eq.s32.totalorder %v1608_v44, %v412_v51  ;;  %1174 = vmatmul.mubr.msk.f32.gmra.mrb[4].mxu1 %vm366_vm1, %v1047_v47 }
 0x218   :  { %v490_v57 = vrot.slane %v409_v38, %v489_v35  ;;  %vm551_vm6 = vcmp.eq.s32.totalorder %v1608_v44, %v409_v38  ;;  %v1049_v58 = vsel %vm552_vm5, 1.0, %v1323_v56 }
 0x219   :  { %v1048_v60 = vsel %vm551_vm6, 1.0, %v1323_v56  ;;  %600 = vst.msk [vmem:[#allocation6 + $0x48] sm:$0xff] %vm366_vm1, %v1049_v58 }
 0x21a   :  { %v492_v61 = vsel %vm491_vm3, %v490_v57, %v485_v54  ;;  %599 = vst.msk [vmem:[#allocation6 + $0x40] sm:$0xff] %vm366_vm1, %v1048_v60  ;;  %v418_v62 = vpop.xlane.xlu1 %417  ;;  %1176 = vmatprep.mubr.msk.f32.mxu1 %vm366_vm1, %v1048_v60 }
 0x21b   :  { %v499_v40 = vsel %vm498_vm4, %v497_v28, %v492_v61  ;;  %v415_v0 = vpop.xlane.xlu0 %414  ;;  %v511_v1 = vrot.slane %v418_v62, %v510_v55  ;;  %vm554_vm9 = vcmp.eq.s32.totalorder %v1608_v44, %v418_v62  ;;  %1177 = vmatmul.mubr.msk.f32.gmra.mrb[6].mxu1 %vm366_vm1, %v1049_v58  ;;  %vm540_vm4 = vcmask 1048512  }
 0x21c   :  { %v504_v3 = vrot.slane %v415_v0, %v503_v59  ;;  %vm553_vm10 = vcmp.eq.s32.totalorder %v1608_v44, %v415_v0  ;;  %v1051_v4 = vsel %vm554_vm9, 1.0, %v1323_v56 }
 0x21d   :  { %v1050_v10 = vsel %vm553_vm10, 1.0, %v1323_v56  ;;  %602 = vst.msk [vmem:[#allocation6 + $0x58] sm:$0xff] %vm366_vm1, %v1051_v4 }
 0x21e   :  { %v506_v11 = vsel %vm505_vm7, %v504_v3, %v499_v40  ;;  %601 = vst.msk [vmem:[#allocation6 + $0x50] sm:$0xff] %vm366_vm1, %v1050_v10  ;;  %v424_v41 = vpop.xlane.xlu1 %423  ;;  %1179 = vmatprep.mubr.msk.f32.mxu1 %vm366_vm1, %v1050_v10 }
 0x21f   :  { %v513_v12 = vsel %vm512_vm8, %v511_v1, %v506_v11  ;;  %v421_v42 = vpop.xlane.xlu0 %420  ;;  %v525_v13 = vrot.slane %v424_v41, %v524_v39  ;;  %vm556_vm13 = vcmp.eq.s32.totalorder %v1608_v44, %v424_v41  ;;  %1180 = vmatmul.mubr.msk.f32.gmra.mrb[8].mxu1 %vm366_vm1, %v1051_v4 }
 0x220   :  { %v518_v15 = vrot.slane %v421_v42, %v517_v63  ;;  %vm555_vm14 = vcmp.eq.s32.totalorder %v1608_v44, %v421_v42  ;;  %v1053_v16 = vsel %vm556_vm13, 1.0, %v1323_v56 }
 0x221   :  { %v1052_v18 = vsel %vm555_vm14, 1.0, %v1323_v56  ;;  %604 = vst.msk [vmem:[#allocation6 + $0x68] sm:$0xff] %vm366_vm1, %v1053_v16 }
 0x222   :  { %v520_v19 = vsel %vm519_vm11, %v518_v15, %v513_v12  ;;  %603 = vst.msk [vmem:[#allocation6 + $0x60] sm:$0xff] %vm366_vm1, %v1052_v18  ;;  %v430_v20 = vpop.xlane.xlu1 %429  ;;  %1182 = vmatprep.mubr.msk.f32.mxu1 %vm366_vm1, %v1052_v18 }
 0x223   :  { %v527_v21 = vsel %vm526_vm12, %v525_v13, %v520_v19  ;;  %v427_v23 = vpop.xlane.xlu0 %426  ;;  %v539_v22 = vrot.slane %v430_v20, %v538_v45  ;;  %vm558_vm2 = vcmp.eq.s32.totalorder %v1608_v44, %v430_v20  ;;  %1183 = vmatmul.mubr.msk.f32.gmra.mrb[10].mxu1 %vm366_vm1, %v1053_v16 }
 0x224   :  { %v532_v46 = vrot.slane %v427_v23, %v531_v17  ;;  %vm557_vm3 = vcmp.eq.s32.totalorder %v1608_v44, %v427_v23  ;;  %v1055_v30 = vsel %vm558_vm2, 1.0, %v1323_v56 }
 0x225   :  { %v1054_v25 = vsel %vm557_vm3, 1.0, %v1323_v56  ;;  %606 = vst.msk [vmem:[#allocation6 + $0x78] sm:$0xff] %vm366_vm1, %v1055_v30 }
 0x226   :  { %v534_v31 = vsel %vm533_vm15, %v532_v46, %v527_v21  ;;  %605 = vst.msk [vmem:[#allocation6 + $0x70] sm:$0xff] %vm366_vm1, %v1054_v25  ;;  %1185 = vmatprep.mubr.msk.f32.mxu1 %vm366_vm1, %v1054_v25 }
 0x227   :  { %v541_v24 = vsel %vm540_vm4, %v539_v22, %v534_v31  ;;  %1186 = vmatmul.mubr.msk.f32.gmra.mrb[12].mxu1 %vm366_vm1, %v1055_v30  ;;  %vm956_vm1 = vcmask 0  }
 0x228   :  { %542 = vst [vmem:[%s1857_s6] sm:$0x1] %v541_v24 }
 0x24b   :  { %v1166_v44 = vpop.f32.mrb[16].mxu0 }
 0x24c   :  { %801 = vst.msk [vmem:[#allocation2 + $0x8] sm:$0xff] %vm70_vm0, %v1166_v44  ;;  %v817_v32 = vsub.f32 %v1166_v44, %v1397_v7  ;;  %v721_v56 = vpop.f32.mrb[17].mxu0 }
 0x24d   :  { %800 = vst.msk [vmem:[#allocation2] sm:$0xff] %vm70_vm0, %v721_v56  ;;  %v816_v33 = vsub.f32 %v721_v56, %v1390_v5 }
 0x24e   :  { %v900_v34 = vmul.f32 %v817_v32, %v817_v32 }
 0x24f   :  { %v899_v27 = vmul.f32 %v816_v33, %v816_v33  ;;  %v1169_v35 = vpop.f32.mrb[0].mxu1 }
 0x250   :  { %v916_v26 = vsel %vm70_vm0, %v900_v34, 0.0  ;;  %803 = vst.msk [vmem:[#allocation2 + $0x18] sm:$0xff] %vm70_vm0, %v1169_v35  ;;  %v819_v36 = vsub.f32 %v1169_v35, %v1407_v9  ;;  %v731_v43 = vpop.f32.mrb[1].mxu1 }
 0x251   :  { %v915_v37 = vsel %vm70_vm0, %v899_v27, 0.0  ;;  %802 = vst.msk [vmem:[#allocation2 + $0x10] sm:$0xff] %vm70_vm0, %v731_v43  ;;  %v818_v7 = vsub.f32 %v731_v43, %v1402_v8 }
 0x252   :  { %v917_v29 = vadd.f32 %v916_v26, %v915_v37  ;;  %v902_v14 = vmul.f32 %v819_v36, %v819_v36 }
 0x253   :  { %v901_v47 = vmul.f32 %v818_v7, %v818_v7 }
 0x254   :  { %v920_v49 = vsel %vm70_vm0, %v902_v14, 0.0 }
 0x255   :  { %v918_v5 = vsel %vm70_vm0, %v901_v47, 0.0 }
 0x256   :  { %v919_v48 = vadd.f32 %v918_v5, %v917_v29 }
 0x258   :  { %v921_v50 = vadd.f32 %v920_v49, %v919_v48 }
 0x25a   :  { %946 = vadd.xlane.f32.xlu0 %v921_v50 }
 0x2e6   :  { %v1172_v51 = vpop.f32.mrb[2].mxu1 }
 0x2e7   :  { %v947_v52 = vpop.xlane.xlu0 %946  ;;  %805 = vst.msk [vmem:[#allocation2 + $0x28] sm:$0xff] %vm70_vm0, %v1172_v51  ;;  %v741_v9 = vpop.f32.mrb[3].mxu1 }
 0x2e8   :  { %v948_v53 = vrot.slane %v947_v52, 4  ;;  %804 = vst.msk [vmem:[#allocation2 + $0x20] sm:$0xff] %vm70_vm0, %v741_v9 }
 0x2ea   :  { %v949_v54 = vadd.f32 %v948_v53, %v947_v52  ;;  %v1175_v8 = vpop.f32.mrb[4].mxu1 }
 0x2eb   :  { %807 = vst.msk [vmem:[#allocation2 + $0x38] sm:$0xff] %vm70_vm0, %v1175_v8  ;;  %v751_v38 = vpop.f32.mrb[5].mxu1 }
 0x2ec   :  { %v950_v28 = vrot.slane %v949_v54, 2  ;;  %806 = vst.msk [vmem:[#allocation2 + $0x30] sm:$0xff] %vm70_vm0, %v751_v38 }
 0x2ee   :  { %v951_v55 = vadd.f32 %v950_v28, %v949_v54  ;;  %v1178_v57 = vpop.f32.mrb[6].mxu1 }
 0x2ef   :  { %809 = vst.msk [vmem:[#allocation2 + $0x48] sm:$0xff] %vm70_vm0, %v1178_v57  ;;  %v761_v58 = vpop.f32.mrb[7].mxu1 }
 0x2f0   :  { %v952_v59 = vrot.slane %v951_v55, 1  ;;  %808 = vst.msk [vmem:[#allocation2 + $0x40] sm:$0xff] %vm70_vm0, %v761_v58 }
 0x2f2   :  { %v953_v60 = vadd.f32 %v952_v59, %v951_v55  ;;  %v1181_v61 = vpop.f32.mrb[8].mxu1 }
 0x2f3   :  { %811 = vst.msk [vmem:[#allocation2 + $0x58] sm:$0xff] %vm70_vm0, %v1181_v61  ;;  %v771_v62 = vpop.f32.mrb[9].mxu1 }
 0x2f4   :  { %1220 = vpush %v953_v60 }
 0x2f5   :  { %810 = vst.msk [vmem:[#allocation2 + $0x50] sm:$0xff] %vm70_vm0, %v771_v62 }
 0x2f6   :  { %v1184_v63 = vpop.f32.mrb[10].mxu1 }
 0x2f7   :  { %813 = vst.msk [vmem:[#allocation2 + $0x68] sm:$0xff] %vm70_vm0, %v1184_v63  ;;  %v781_v39 = vpop.f32.mrb[11].mxu1 }
 0x2f8   :  { %812 = vst.msk [vmem:[#allocation2 + $0x60] sm:$0xff] %vm70_vm0, %v781_v39 }
 0x2fa   :  { %v1187_v40 = vpop.f32.mrb[12].mxu1 }
 0x2fb   :  { %815 = vst.msk [vmem:[#allocation2 + $0x78] sm:$0xff] %vm70_vm0, %v1187_v40  ;;  %v791_v0 = vpop.f32.mrb[13].mxu1 }
 0x2fc   :  { %814 = vst.msk [vmem:[#allocation2 + $0x70] sm:$0xff] %vm70_vm0, %v791_v0 }
 0x325   :  { %s1221_s6 = spop %1220 }
 0x326   :  { %v955_v1 = vstv %s1221_s6 }
 0x327   :  { %957 = vst.msk [vmem:[#allocation7] sm:$0x1] %vm956_vm1, %v955_v1 }
 0x328   :  { %962 = vsyncadd [#allocation3], 1536  ;;  %s1324_s16 = smov [#allocation2]  }
 0x329   :  { %s963_s17 = sshll.u32 %s1324_s16, 4  ;;  %s964_s17 = int_to_ptr.vmem [resolvable:$true] %s963_s17 }
 0x32a   :  { %s1229_s18 = scalar_lea.vmem %s964_s17, 512  ;;  %s1233_s2 = scalar_lea.vmem %s964_s17, 2048 }
 0x32b   :  { %p1230_p0 = scmp.ne.s32.totalorder %s964_s17, %s1229_s18  ;;  %p1234_p1 = scmp.lt.s32.totalorder %s964_s17, %s964_s17 }
 0x32c   :  { %p1235_p2 = scmp.lt.s32.totalorder %s1233_s2, %s1229_s18 }
 0x32e   :  { %p1236_p3 = por %p1235_p2, %p1234_p1 }
 0x330   :  { %p1237_p4 = pnand %p1236_p3, %p1230_p0 }
 0x332   :  { %1240 = shalt.err (!%p1237_p4)
}
 0x333   :  { %s1241_s21 = scalar_lea.hbm %s1855_s4, 512 }
 0x334   :  { %p1242_p5 = scmp.ne.s32.totalorder %s1855_s4, %s1241_s21  ;;  %p1245_p6 = scmp.lt.u32.totalorder %s1241_s21, %s1855_s4 }
 0x336   :  { %p1247_p7 = pnand %p1245_p6, %p1242_p5 }
 0x338   :  { %1250 = shalt.err (!%p1247_p7)
}
 0x339   :  { %s1325_s26 = smov 128   ;;  %s1326_s27 = smov 8  }
 0x33a   :  { %969 = dma.vmem_to_hbm [thread:$0]  %s964_s17, 512, %s1855_s4, [#allocation3], %s1325_s26, %s1325_s26, %s1326_s27  }
 0x33b   :  { %974 = vsyncadd [#allocation5], 1536  ;;  %s1327_s29 = smov [#allocation4]  }
 0x33c   :  { %s975_s30 = sshll.u32 %s1327_s29, 4  ;;  %s976_s30 = int_to_ptr.vmem [resolvable:$true] %s975_s30 }
 0x33d   :  { %s1251_s9 = scalar_lea.vmem %s976_s30, 512  ;;  %s1255_s10 = scalar_lea.vmem %s976_s30, 2048 }
 0x33e   :  { %p1252_p8 = scmp.ne.s32.totalorder %s976_s30, %s1251_s9  ;;  %p1256_p9 = scmp.lt.s32.totalorder %s976_s30, %s976_s30 }
 0x33f   :  { %p1257_p10 = scmp.lt.s32.totalorder %s1255_s10, %s1251_s9 }
 0x341   :  { %p1258_p11 = por %p1257_p10, %p1256_p9 }
 0x343   :  { %p1259_p12 = pnand %p1258_p11, %p1252_p8 }
 0x345   :  { %1262 = shalt.err (!%p1259_p12)
}
 0x346   :  { %s1263_s13 = scalar_lea.hbm %s1856_s5, 512 }
 0x347   :  { %p1264_p13 = scmp.ne.s32.totalorder %s1856_s5, %s1263_s13  ;;  %p1267_p0 = scmp.lt.u32.totalorder %s1263_s13, %s1856_s5 }
 0x349   :  { %p1269_p1 = pnand %p1267_p0, %p1264_p13 }
 0x34b   :  { %1272 = shalt.err (!%p1269_p1)
}
 0x34c   :  { %981 = dma.vmem_to_hbm [thread:$0]  %s976_s30, 512, %s1856_s5, [#allocation5], %s1325_s26, %s1325_s26, %s1326_s27  }
 0x34d   :  { %988 = vsyncadd [#allocation5], 1536  ;;  %s1328_s16 = smov [#allocation6]   ;;  %s1329_s18 = smov [#allocation7]  }
 0x34e   :  { %s989_s17 = sshll.u32 %s1328_s16, 4  ;;  %s1002_s2 = sshll.u32 %s1329_s18, 4  ;;  %s990_s17 = int_to_ptr.vmem [resolvable:$true] %s989_s17  ;;  %s1003_s2 = int_to_ptr.vmem [resolvable:$true] %s1002_s2 }
 0x34f   :  { %s1273_s19 = scalar_lea.vmem %s990_s17, 512  ;;  %s1277_s20 = scalar_lea.vmem %s990_s17, 2048 }
 0x350   :  { %p1274_p2 = scmp.ne.s32.totalorder %s990_s17, %s1273_s19  ;;  %p1278_p3 = scmp.lt.s32.totalorder %s990_s17, %s990_s17 }
 0x351   :  { %p1279_p4 = scmp.lt.s32.totalorder %s1277_s20, %s1273_s19 }
 0x353   :  { %p1280_p5 = por %p1279_p4, %p1278_p3 }
 0x355   :  { %p1281_p6 = pnand %p1280_p5, %p1274_p2 }
 0x357   :  { %1284 = shalt.err (!%p1281_p6)
}
 0x358   :  { %s1285_s23 = scalar_lea.hbm %s1858_s7, 512 }
 0x359   :  { %p1286_p7 = scmp.ne.s32.totalorder %s1858_s7, %s1285_s23  ;;  %p1289_p8 = scmp.lt.u32.totalorder %s1285_s23, %s1858_s7 }
 0x35b   :  { %p1291_p9 = pnand %p1289_p8, %p1286_p7 }
 0x35d   :  { %1294 = shalt.err (!%p1291_p9)
}
 0x35e   :  { %995 = dma.vmem_to_hbm [thread:$0]  %s990_s17, 512, %s1858_s7, [#allocation5], %s1325_s26, %s1325_s26, %s1326_s27  }
 0x35f   :  { %s1295_s30 = scalar_lea.vmem %s1003_s2, 16  ;;  %s1299_s9 = scalar_lea.vmem %s1003_s2, 32 }
 0x360   :  { %p1296_p10 = scmp.ne.s32.totalorder %s1003_s2, %s1295_s30  ;;  %p1300_p11 = scmp.lt.s32.totalorder %s1003_s2, %s1003_s2 }
 0x361   :  { %p1301_p12 = scmp.lt.s32.totalorder %s1299_s9, %s1295_s30 }
 0x363   :  { %p1302_p13 = por %p1301_p12, %p1300_p11 }
 0x365   :  { %p1303_p0 = pnand %p1302_p13, %p1296_p10 }
 0x367   :  { %1306 = shalt.err (!%p1303_p0)
}
 0x368   :  { %s1307_s12 = scalar_lea.hbm %s1859_s8, 16 }
 0x369   :  { %p1308_p1 = scmp.ne.s32.totalorder %s1859_s8, %s1307_s12  ;;  %p1311_p2 = scmp.lt.u32.totalorder %s1307_s12, %s1859_s8 }
 0x36b   :  { %p1313_p3 = pnand %p1311_p2, %p1308_p1 }
 0x36d   :  { %1316 = shalt.err (!%p1313_p3)
}
 0x36e   :  { %1005 = dma.vmem_to_hbm [thread:$0]  %s1003_s2, 16, %s1859_s8, [#allocation8]  }
 0x36f   :  { %1317 = dma.done.wait [#allocation3], 2048  }
 0x370   :  { %1318 = vsyncadd [#allocation3], 4294965248 }
 0x371   :  { %1319 = dma.done.wait [#allocation5], 4096  }
 0x372   :  { %1320 = vsyncadd [#allocation5], 4294963200 }
 0x373   :  { %1321 = dma.done.wait [#allocation8], 16  }
 0x374   :  { %1322 = vsyncadd [#allocation8], 4294967280 }
 0x375   :  { %1020 = vsyncpa [#allocation3], 1 }
 0x376   :  { %1021 = vsyncpa [#allocation5], 1 }
 0x377   :  { %1022 = vsyncpa [#allocation8], 1 }

</bundles_post_ra>
